<compile_context>
chip_gen: v7x
topology: tpu7x:2x2x1
jax: 0.10.0
libtpu: 0.0.40
codegen_flags: <defaults>
</compile_context>

<pallas_src>
from typing import Dict, List, Union

import jax
import jax.numpy as jnp
from jax.experimental import pallas as pl
from jax.experimental.pallas import tpu as pltpu

LANE = 128
_VMEM_LIMIT_BYTES = 48 * 1024 * 1024   # safe headroom on v7x (64 MiB/TC) and v5e/v6e
_FAST_PATH_BUDGET = 36 * 1024 * 1024   # cap on double-buffered fast-path footprint


# ------------------------------ helpers ------------------------------------ #
def _round_up(x: int, m: int) -> int:
    return ((x + m - 1) // m) * m


def _cdiv(a: int, b: int) -> int:
    return (a + b - 1) // b


def _largest_tile(padded: int, cap: int, base: int = LANE) -> int:
    """Largest multiple of `base` that divides `padded` (a multiple of base) and is <= cap."""
    t = max(base, (min(cap, padded) // base) * base)
    while padded % t:
        t -= base
    return t


def _dim_sizes(out_concept_dimensions: Dict[int, Union[int, List[str]]]):
    sizes = []
    for k in sorted(out_concept_dimensions.keys()):
        v = out_concept_dimensions[k]
        sizes.append(v if isinstance(v, int) else len(v))
    return sizes


# ----------------------------- Pallas kernels ------------------------------- #
def _bottleneck_fast_kernel(x_ref, w_ref, b_ref, o_ref):
    # x: (tm, Fp)  w: (Fp, tn)  b: (1, tn)  o: (tm, tn)   — weight-resident, no K axis
    o_ref[...] = (
        jnp.dot(x_ref[...], w_ref[...], preferred_element_type=jnp.float32)
        + b_ref[...]
    ).astype(o_ref.dtype)


def _bottleneck_ktiled_kernel(x_ref, w_ref, b_ref, o_ref):
    # x: (tm, tk)  w: (tk, tn)  b: (1, tn)  o: (tm, tn) — accumulate directly in f32 o_ref
    k = pl.program_id(2)
    part = jnp.dot(x_ref[...], w_ref[...], preferred_element_type=jnp.float32)

    @pl.when(k == 0)
    def _():
        o_ref[...] = b_ref[...] + part          # bias added exactly once

    @pl.when(k > 0)
    def _():
        o_ref[...] += part


# ------------------------------ host wrapper -------------------------------- #
def linear_bottleneck_pallas(x, w_padded, b_padded, out_features,
                             compute_dtype=jnp.float32, force_ktiled=False):
    """y = x @ W + b with pre-padded (lane-aligned) W and b.

    w_padded: (Fp, Cp) zero-padded, Fp/Cp multiples of 128 (pad done once by caller).
    b_padded: (1, Cp) float32, zero-padded.
    Returns: (B, out_features) float32.
    """
    B, F = x.shape
    Fp, Cp = w_padded.shape
    assert Fp % LANE == 0 and Cp % LANE == 0 and Fp >= F
    C = out_features

    is_bf16 = (compute_dtype == jnp.bfloat16)
    in_bytes = 2 if is_bf16 else 4
    sub = 16 if is_bf16 else 8

    # Only x needs per-call padding, and only along F (zeros → exact result).
    if Fp != F:
        x = jnp.pad(x, ((0, 0), (0, Fp - F)))
    if x.dtype != compute_dtype:
        x = x.astype(compute_dtype)
    if w_padded.dtype != compute_dtype:
        w_padded = w_padded.astype(compute_dtype)

    tn = _largest_tile(Cp, 512)
    tm = min(256, _round_up(B, sub))

    # v7x (2 TCs): make sure at least one "parallel" axis has >= 2 blocks.
    if _cdiv(B, tm) == 1 and Cp // tn == 1 and B > sub:
        tm = _round_up(_cdiv(B, 2), sub)

    cost = pl.CostEstimate(
        flops=2 * B * F * C,
        bytes_accessed=in_bytes * (B * F + F * C) + 4 * (B * C + C),
        transcendentals=0,
    )

    fast_footprint = (2 * (tm * Fp + Fp * tn) * in_bytes   # x + W, double-buffered
                      + 2 * tm * tn * 4 + 2 * tn * 4)      # out + bias
    use_fast = (not force_ktiled) and fast_footprint <= _FAST_PATH_BUDGET

    if use_fast:
        grid = (_cdiv(B, tm), Cp // tn)
        out = pl.pallas_call(
            _bottleneck_fast_kernel,
            out_shape=jax.ShapeDtypeStruct((B, Cp), jnp.float32),
            grid_spec=pltpu.PrefetchScalarGridSpec(
                num_scalar_prefetch=0,
                grid=grid,
                in_specs=[
                    pl.BlockSpec((tm, Fp), lambda i, j: (i, 0)),   # x strip (full K)
                    pl.BlockSpec((Fp, tn), lambda i, j: (0, j)),   # W resident per N tile
                    pl.BlockSpec((1, tn), lambda i, j: (0, j)),    # bias (N-only)
                ],
                out_specs=pl.BlockSpec((tm, tn), lambda i, j: (i, j)),
            ),
            compiler_params=pltpu.CompilerParams(
                dimension_semantics=("parallel", "parallel"),
                vmem_limit_bytes=_VMEM_LIMIT_BYTES,
            ),
            cost_estimate=cost,
        )(x, w_padded, b_padded)
    else:
        tk = _largest_tile(Fp, 512)
        grid = (_cdiv(B, tm), Cp // tn, Fp // tk)
        out = pl.pallas_call(
            _bottleneck_ktiled_kernel,
            out_shape=jax.ShapeDtypeStruct((B, Cp), jnp.float32),
            grid_spec=pltpu.PrefetchScalarGridSpec(
                num_scalar_prefetch=0,
                grid=grid,
                in_specs=[
                    pl.BlockSpec((tm, tk), lambda i, j, k: (i, k)),
                    pl.BlockSpec((tk, tn), lambda i, j, k: (k, j)),
                    pl.BlockSpec((1, tn), lambda i, j, k: (0, j)),
                ],
                out_specs=pl.BlockSpec((tm, tn), lambda i, j, k: (i, j)),
            ),
            compiler_params=pltpu.CompilerParams(
                dimension_semantics=("parallel", "parallel", "arbitrary"),
                vmem_limit_bytes=_VMEM_LIMIT_BYTES,
            ),
            cost_estimate=cost,
        )(x, w_padded, b_padded)

    if Cp != C:
        out = out[:, :C]
    return out


# --------------------------- Module-level glue ------------------------------ #
class PallasLinearBottleneck:
    """JAX/Pallas equivalent of a concrete BaseBottleneck (linear variant)."""

    def __init__(self, in_features: int,
                 out_concept_dimensions: Dict[int, Union[int, List[str]]],
                 key=None, compute_dtype=jnp.float32):
        self.out_concept_dimensions = out_concept_dimensions
        self.dim_sizes = _dim_sizes(out_concept_dimensions)
        out_size = 1
        for s in self.dim_sizes:
            out_size *= s
        self.out_size = out_size
        self.in_features = in_features
        self.compute_dtype = compute_dtype

        if key is None:
            key = jax.random.PRNGKey(0)
        kw, kb = jax.random.split(key)
        bound = 1.0 / float(in_features) ** 0.5   # matches nn.Linear init scale
        self.w = jax.random.uniform(kw, (in_features, out_size),
                                    minval=-bound, maxval=bound, dtype=jnp.float32)
        self.b = jax.random.uniform(kb, (out_size,),
                                    minval=-bound, maxval=bound, dtype=jnp.float32)

        # Pre-pad parameters ONCE (lane-align F and C to 128); bias stays f32.
        Fp = _round_up(in_features, LANE)
        Cp = _round_up(out_size, LANE)
        self.w_padded = jnp.pad(
            self.w, ((0, Fp - in_features), (0, Cp - out_size))
        ).astype(compute_dtype)
        self.b_padded = jnp.pad(self.b, (0, Cp - out_size)).reshape(1, Cp)

    def __call__(self, x):
        # x: (batch, in_features)  ->  (batch, d1, d2, ...)
        flat = linear_bottleneck_pallas(
            x, self.w_padded, self.b_padded, self.out_size,
            compute_dtype=self.compute_dtype)
        return flat.reshape((x.shape[0], *self.dim_sizes))


# --------------------------------- main ------------------------------------ #
if __name__ == "__main__":
    key = jax.random.PRNGKey(0)
    kx, kp, kx2 = jax.random.split(key, 3)

    # ---- Test 1: docstring example, f32 weight-resident fast path -----------
    batch, in_features = 8, 32
    out_concept_dimensions = {1: ["concept_a", "concept_b"], 2: 3}   # -> (B, 2, 3)
    x = jax.random.normal(kx, (batch, in_features), dtype=jnp.float32)

    bottleneck = PallasLinearBottleneck(in_features, out_concept_dimensions, key=kp)
    out = jax.block_until_ready(bottleneck(x))
    ref = (x @ bottleneck.w + bottleneck.b).reshape(batch, 2, 3)
    assert out.shape == (batch, 2, 3), out.shape
    assert jnp.allclose(out, ref, atol=1e-5, rtol=1e-5)

    # ---- Test 2: K-tiled fallback path (forced), ragged shapes --------------
    B2, F2, C2 = 13, 600, 70
    x2 = jax.random.normal(kx2, (B2, F2), dtype=jnp.float32)
    w2 = jax.random.normal(jax.random.PRNGKey(1), (F2, C2), dtype=jnp.float32) * 0.1
    b2 = jax.random.normal(jax.random.PRNGKey(2), (C2,), dtype=jnp.float32)
    Fp2, Cp2 = _round_up(F2, LANE), _round_up(C2, LANE)
    w2p = jnp.pad(w2, ((0, Fp2 - F2), (0, Cp2 - C2)))
    b2p = jnp.pad(b2, (0, Cp2 - C2)).reshape(1, Cp2)
    y2 = jax.block_until_ready(
        linear_bottleneck_pallas(x2, w2p, b2p, C2, force_ktiled=True))
    ref2 = x2 @ w2 + b2
    assert y2.shape == ref2.shape
    assert jnp.allclose(y2, ref2, atol=1e-4, rtol=1e-4)

    # ---- Test 3: bf16 compute path (MXU-native on v5e/v6e/v7x) --------------
    bottleneck_bf16 = PallasLinearBottleneck(in_features, out_concept_dimensions,
                                             key=kp, compute_dtype=jnp.bfloat16)
    out_bf16 = jax.block_until_ready(bottleneck_bf16(x))
    ref_bf16 = (x @ bottleneck_bf16.w + bottleneck_bf16.b).reshape(batch, 2, 3)
    assert out_bf16.shape == (batch, 2, 3)
    assert jnp.allclose(out_bf16, ref_bf16, atol=3e-2, rtol=3e-2)

    print("KERNEL_OK")
</pallas_src>

<mosaic_0001>
module attributes {stable_mosaic.version = 11 : i64} {
  func.func @_bottleneck_fast_kernel(%arg0: i32, %arg1: i32, %arg2: memref<8x128xf32, #tpu.memory_space<vmem>>, %arg3: memref<128x128xf32, #tpu.memory_space<vmem>>, %arg4: memref<1x128xf32, #tpu.memory_space<vmem>>, %arg5: memref<8x128xf32, #tpu.memory_space<vmem>>) attributes {dimension_semantics = [#tpu.dimension_semantics<parallel>, #tpu.dimension_semantics<parallel>], iteration_bounds = array<i64: 1, 1>, scalar_prefetch = 0 : i64, scratch_operands = 0 : i64, tpu.core_type = #tpu.core_type<tc>, window_params = [{transform_indices = @transform_0, window_bounds = array<i64: 8, 128>}, {transform_indices = @transform_1, window_bounds = array<i64: 128, 128>}, {transform_indices = @transform_2, window_bounds = array<i64: 1, 128>}, {transform_indices = @transform_3, window_bounds = array<i64: 8, 128>}]} {
    %c0 = arith.constant 0 : index
    %c0_0 = arith.constant 0 : index
    %0 = vector.load %arg2[%c0, %c0_0] : memref<8x128xf32, #tpu.memory_space<vmem>>, vector<8x128xf32>
    %c0_1 = arith.constant 0 : index
    %c0_2 = arith.constant 0 : index
    %1 = vector.load %arg3[%c0_1, %c0_2] : memref<128x128xf32, #tpu.memory_space<vmem>>, vector<128x128xf32>
    %cst = arith.constant dense<0.000000e+00> : vector<8x128xf32>
    %2 = tpu.matmul %0, %1, %cst {dimension_numbers = #tpu.dot_dimension_numbers<[1], [0], [0], [1], [0, 0, 1, 1], [], []>} : vector<8x128xf32>, vector<128x128xf32>, vector<8x128xf32> -> vector<8x128xf32>
    %c0_3 = arith.constant 0 : index
    %c0_4 = arith.constant 0 : index
    %3 = vector.load %arg4[%c0_3, %c0_4] : memref<1x128xf32, #tpu.memory_space<vmem>>, vector<1x128xf32>
    %4 = vector.broadcast %3 : vector<1x128xf32> to vector<8x128xf32>
    %5 = arith.addf %2, %4 : vector<8x128xf32>
    %c0_5 = arith.constant 0 : index
    %c0_6 = arith.constant 0 : index
    %6 = vector.load %arg5[%c0_5, %c0_6] : memref<8x128xf32, #tpu.memory_space<vmem>>, vector<8x128xf32>
    tpu.vector_store %arg5[%c0_5, %c0_6], %5 {strides = array<i32>} : memref<8x128xf32, #tpu.memory_space<vmem>>, vector<8x128xf32>,
    return
  }
  func.func @transform_0(%arg0: i32, %arg1: i32) -> (i32, i32) {
    %c0_i32 = arith.constant 0 : i32
    %c0_i32_0 = arith.constant 0 : i32
    return %arg0, %c0_i32 : i32, i32
  }
  func.func @transform_1(%arg0: i32, %arg1: i32) -> (i32, i32) {
    %c0_i32 = arith.constant 0 : i32
    %c0_i32_0 = arith.constant 0 : i32
    return %c0_i32, %arg1 : i32, i32
  }
  func.func @transform_2(%arg0: i32, %arg1: i32) -> (i32, i32) {
    %c0_i32 = arith.constant 0 : i32
    %c0_i32_0 = arith.constant 0 : i32
    return %c0_i32, %arg1 : i32, i32
  }
  func.func @transform_3(%arg0: i32, %arg1: i32) -> (i32, i32) {
    %c0_i32 = arith.constant 0 : i32
    return %arg0, %arg1 : i32, i32
  }
}

</mosaic_0001>

<bundles_post_ra>
// kernel: tpu_custom_call.1
= control target key start
LH: loop header
LB: loop body
LE: loop exit
PB: predicated region body
PF: predicated region fallthrough
CT: control target
= control target key end

     0   :  { %8 = vsyncpa [#allocation3], 0  ;;  %s383_s0 = inlined_call_operand.hbm [shape: f32[8,128], index: 0, kind: input, shape index: {}]   ;;  %s384_s1 = inlined_call_operand.hbm [shape: f32[128,128], index: 1, kind: input, shape index: {}]   ;;  %s385_s2 = inlined_call_operand.vmem [shape: f32[1,128], index: 2, kind: input, shape index: {}]   ;;  %s386_s3 = inlined_call_operand.hbm [shape: f32[8,128], index: 3, kind: output, shape index: {}]  }
   0x1   :  { %9 = vsyncpa [#allocation6], 0 }
   0x2   :  { %10 = vsyncpa [#allocation4], 0  ;;  %s309_s12 = smov [#allocation2]   ;;  %s310_s14 = smov [#allocation5]  }
   0x3   :  { %s17_s13 = sshll.u32 %s309_s12, 4  ;;  %s26_s15 = sshll.u32 %s310_s14, 4  ;;  %s18_s13 = int_to_ptr.vmem [resolvable:$true] %s17_s13  ;;  %s337_s15 = int_to_ptr.vmem [resolvable:$true] %s26_s15 }
   0x4   :  { %s237_s18 = scalar_lea.hbm %s383_s0, 128 }
   0x5   :  { %p238_p0 = scmp.ne.s32.totalorder %s383_s0, %s237_s18  ;;  %p241_p1 = scmp.lt.u32.totalorder %s237_s18, %s383_s0 }
   0x7   :  { %p243_p2 = pnand %p241_p1, %p238_p0 }
   0x9   :  { %246 = shalt.err (!%p243_p2)
}
   0xa   :  { %s247_s23 = scalar_lea.vmem %s18_s13, 128  ;;  %p252_p4 = scmp.lt.s32.totalorder %s18_s13, %s18_s13 }
   0xb   :  { %p248_p3 = scmp.ne.s32.totalorder %s18_s13, %s247_s23  ;;  %p253_p5 = scmp.lt.s32.totalorder %s247_s23, %s247_s23 }
   0xd   :  { %p254_p6 = por %p253_p5, %p252_p4 }
   0xf   :  { %p255_p7 = pnand %p254_p6, %p248_p3 }
  0x11   :  { %258 = shalt.err (!%p255_p7)
}
  0x12   :  { %20 = dma.hbm_to_vmem [thread:$0]  %s383_s0, 128, %s18_s13, [#allocation3]  }
  0x13   :  { %s259_s28 = scalar_lea.hbm %s384_s1, 2048 }
  0x14   :  { %p260_p8 = scmp.ne.s32.totalorder %s384_s1, %s259_s28  ;;  %p263_p9 = scmp.lt.u32.totalorder %s259_s28, %s384_s1 }
  0x16   :  { %p265_p10 = pnand %p263_p9, %p260_p8 }
  0x18   :  { %268 = shalt.err (!%p265_p10)
}
  0x19   :  { %s269_s6 = scalar_lea.vmem %s337_s15, 2048  ;;  %p274_p12 = scmp.lt.s32.totalorder %s337_s15, %s337_s15 }
  0x1a   :  { %p270_p11 = scmp.ne.s32.totalorder %s337_s15, %s269_s6  ;;  %p275_p13 = scmp.lt.s32.totalorder %s269_s6, %s269_s6 }
  0x1c   :  { %p276_p0 = por %p275_p13, %p274_p12 }
  0x1e   :  { %p277_p1 = pnand %p276_p0, %p270_p11 }
  0x20   :  { %280 = shalt.err (!%p277_p1)
}
  0x21   :  { %s311_s0 = smov 128   ;;  %s312_s7 = smov 8  }
  0x22   :  { %32 = dma.hbm_to_vmem [thread:$0]  %s384_s1, 2048, %s337_s15, [#allocation6], %s311_s0, %s311_s0, %s312_s7  }
  0x23   :  { %303 = dma.done.wait [#allocation3], 128  }
  0x24   :  { %304 = vsyncadd [#allocation3], 4294967168 }
  0x25   :  { %305 = dma.done.wait [#allocation6], 2048  }
  0x26   :  { %306 = vsyncadd [#allocation6], 4294965248  ;;  %v313_v0 = vmov 0.0|0.0   ;;  %vm314_vm0 = vmmov 0   ;;  %v315_v1 = vmov 0.0   ;;  %v42_v2 = vld [vmem:[#allocation5] sm:$0xff] }
  0x27   :  { %205 = vmatprep.subr.bf16.mxu0 %v313_v0  ;;  %202 = vmatprep.mubr.msk.f32.mxu0 %vm314_vm0, %v315_v1  ;;  %v43_v3 = vld [vmem:[#allocation5 + $0x8] sm:$0xff]  ;;  %v44_v4 = vld [vmem:[#allocation5 + $0x10] sm:$0xff]  ;;  %v45_v6 = vld [vmem:[#allocation5 + $0x18] sm:$0xff]  ;;  %s316_s11 = smov [#allocation7]  }
  0x28   :  { %v206_v5 = vpack.c.bf16 %v43_v3, %v42_v2  ;;  %v209_v7 = vpack.c.bf16 %v45_v6, %v44_v4  ;;  %v46_v8 = vld [vmem:[#allocation5 + $0x20] sm:$0xff]  ;;  %v47_v9 = vld [vmem:[#allocation5 + $0x28] sm:$0xff]  ;;  %v48_v11 = vld [vmem:[#allocation5 + $0x30] sm:$0xff]  ;;  %s142_s12 = sshll.u32 %s316_s11, 4  ;;  %s143_s12 = int_to_ptr.vmem [resolvable:$true] %s142_s12 }
  0x29   :  { %v212_v10 = vpack.c.bf16 %v47_v9, %v46_v8  ;;  %v49_v12 = vld [vmem:[#allocation5 + $0x38] sm:$0xff]  ;;  %v50_v14 = vld [vmem:[#allocation5 + $0x40] sm:$0xff]  ;;  %v51_v15 = vld [vmem:[#allocation5 + $0x48] sm:$0xff]  ;;  %s281_s13 = scalar_lea.vmem %s143_s12, 128  ;;  %p286_p3 = scmp.lt.s32.totalorder %s143_s12, %s143_s12 }
  0x2a   :  { %207 = vmatpush3.bf16.msra.mxu0 %v206_v5  ;;  %v215_v13 = vpack.c.bf16 %v49_v12, %v48_v11  ;;  %v218_v16 = vpack.c.bf16 %v51_v15, %v50_v14  ;;  %v52_v17 = vld [vmem:[#allocation5 + $0x50] sm:$0xff]  ;;  %v53_v18 = vld [vmem:[#allocation5 + $0x58] sm:$0xff]  ;;  %v54_v20 = vld [vmem:[#allocation5 + $0x60] sm:$0xff]  ;;  %p282_p2 = scmp.ne.s32.totalorder %s143_s12, %s281_s13  ;;  %p287_p4 = scmp.lt.s32.totalorder %s281_s13, %s281_s13 }
  0x2b   :  { %208 = vmatprep.subr.bf16.mxu0 %v313_v0  ;;  %v221_v19 = vpack.c.bf16 %v53_v18, %v52_v17  ;;  %v55_v21 = vld [vmem:[#allocation5 + $0x68] sm:$0xff]  ;;  %v56_v23 = vld [vmem:[#allocation5 + $0x70] sm:$0xff]  ;;  %v57_v24 = vld [vmem:[#allocation5 + $0x78] sm:$0xff] }
  0x2c   :  { %v224_v22 = vpack.c.bf16 %v55_v21, %v54_v20  ;;  %v227_v25 = vpack.c.bf16 %v57_v24, %v56_v23  ;;  %v41_v26 = vld [vmem:[#allocation2] sm:$0xff]  ;;  %p288_p5 = por %p287_p4, %p286_p3 }
  0x2d   :  { %v152_v27 = vld [vmem:[%s385_s2] ss:$0 sm:$0xff] }
  0x2e   :  { %210 = vmatpush3.bf16.msra.mxu0 %v209_v7  ;;  %p289_p6 = pnand %p288_p5, %p282_p2 }
  0x2f   :  { %211 = vmatprep.subr.bf16.mxu0 %v313_v0 }
  0x32   :  { %213 = vmatpush3.bf16.msra.mxu0 %v212_v10 }
  0x33   :  { %214 = vmatprep.subr.bf16.mxu0 %v313_v0 }
  0x36   :  { %216 = vmatpush3.bf16.msra.mxu0 %v215_v13 }
  0x37   :  { %217 = vmatprep.subr.bf16.mxu0 %v313_v0 }
  0x3a   :  { %219 = vmatpush3.bf16.msra.mxu0 %v218_v16 }
  0x3b   :  { %220 = vmatprep.subr.bf16.mxu0 %v313_v0 }
  0x3e   :  { %222 = vmatpush3.bf16.msra.mxu0 %v221_v19 }
  0x3f   :  { %223 = vmatprep.subr.bf16.mxu0 %v313_v0 }
  0x42   :  { %225 = vmatpush3.bf16.msra.mxu0 %v224_v22 }
  0x43   :  { %226 = vmatprep.subr.bf16.mxu0 %v313_v0 }
  0x46   :  { %228 = vmatpush3.bf16.msra.mxu0 %v227_v25 }
  0x49   :  { %203 = vmatmul.mubr.f32.vlgmr.msra.gmra.mrb[0].mxu0 %v41_v26 }
 0x11c   :  { %v131_v28 = vpop.f32.mrb[0].mxu0 }
 0x11d   :  { %v132_v29 = vadd.f32 %v152_v27, %v131_v28  ;;  %v204_v30 = vpop.f32.mrb[1].mxu0 }
 0x11f   :  { %135 = vst [vmem:[#allocation7] sm:$0xff] %v132_v29 }
 0x120   :  { %292 = shalt.err (!%p289_p6)
}
 0x121   :  { %s293_s16 = scalar_lea.hbm %s386_s3, 128 }
 0x122   :  { %p294_p7 = scmp.ne.s32.totalorder %s386_s3, %s293_s16  ;;  %p297_p8 = scmp.lt.u32.totalorder %s293_s16, %s386_s3 }
 0x124   :  { %p299_p9 = pnand %p297_p8, %p294_p7 }
 0x126   :  { %302 = shalt.err (!%p299_p9)
}
 0x127   :  { %145 = dma.vmem_to_hbm [thread:$0]  %s143_s12, 128, %s386_s3, [#allocation4]  }
 0x128   :  { %307 = dma.done.wait [#allocation4], 128  }
 0x129   :  { %308 = vsyncadd [#allocation4], 4294967168 }
 0x12a   :  { %149 = vsyncpa [#allocation3], 1 }
 0x12b   :  { %150 = vsyncpa [#allocation6], 1 }
 0x12c   :  { %151 = vsyncpa [#allocation4], 1 }

</bundles_post_ra>
